<compile_context>
chip_gen: v5e
topology: v5e:2x2
jax: 0.10.0
libtpu: 0.0.40
codegen_flags: <defaults>
</compile_context>

<pallas_src>
import jax
import jax.numpy as jnp
from jax.experimental import pallas as pl
from jax.experimental.pallas import tpu as pltpu


# ---------------------------------------------------------------------------
# Trace-time tiling helpers (pure python ints).
# ---------------------------------------------------------------------------
_VMEM_CAP_BYTES = 48 << 20          # leave headroom below v7x's 64 MiB VMEM


def _vmem_limit(block_bytes):
    # double-buffered dominant block + misc, clamped to a cross-gen safe range.
    return int(min(_VMEM_CAP_BYTES, max(16 << 20, 4 * block_bytes + (2 << 20))))


def _channel_tiling(c_in, n_batch, target=512):
    """Channel tile dividing C_in: multiple of 8 (or full C_in), <= target.

    When N == 1 we prefer >= 2 channel tiles so v7x's two TensorCores both get
    pass-1 work (pass 1's parallel grid axes are (N, c_tiles))."""
    if c_in % 8 != 0:
        return c_in, 1                               # full-dim fallback
    start = min(target, c_in)
    start -= start % 8
    c_tile = c_in
    for t in range(start, 7, -8):
        if c_in % t == 0:
            c_tile = t
            break
    if n_batch == 1 and c_tile == c_in and c_in >= 16 and (c_in // 2) % 8 == 0:
        c_tile = c_in // 2
    return c_tile, c_in // c_tile


def _hw_tiling(hw, rows, itemsize, budget_bytes, target):
    """Last-dim tile for a (rows, hw) slab.

    Either the full HW (allowed even when HW % 128 != 0, no ragged handling
    needed) when it fits the per-buffer budget, or a multiple of 128 sized to
    the budget (the ragged last tile is handled by the caller)."""
    if rows * hw * itemsize <= budget_bytes:
        return hw, 1
    max_tile = budget_bytes // max(1, rows * itemsize)
    tile = min(target, max_tile)
    tile = max(128, tile - tile % 128)
    return tile, -(-hw // tile)


# ---------------------------------------------------------------------------
# Kernels
# ---------------------------------------------------------------------------
def _make_channel_sum_kernel(hw, hw_tile, hw_tiles):
    ragged = hw % hw_tile            # python int; > 0 only when the last tile
                                     # overhangs the true HW extent
    def kernel(x_ref, sum_ref):
        # x_ref:   (1, c_tile, hw_tile)   unpadded input tile
        # sum_ref: (1, c_tile, 1) f32     resident accumulator across HW tiles
        k = pl.program_id(2)
        x = x_ref[...]
        if ragged:
            # Zero the out-of-bounds lanes of the ragged last tile (OOB reads
            # return garbage); other tiles get a full-width limit (no-op).
            lane = jax.lax.broadcasted_iota(jnp.int32, x.shape, 2)
            limit = jnp.where(k == hw_tiles - 1, ragged, hw_tile)
            x = jnp.where(lane < limit, x, jnp.zeros_like(x))
        partial = jnp.sum(x, axis=-1, keepdims=True, dtype=jnp.float32)

        @pl.when(k == 0)
        def _():
            sum_ref[...] = partial

        @pl.when(k != 0)
        def _():
            sum_ref[...] += partial

    return kernel


def _conv_bn_relu_broadcast_kernel(s_ref, w_ref, scale_ref, bias_ref, o_ref):
    # s_ref: (1, 1, C_in) f32 channel sums for batch n (1/HW folded into scale)
    # w_ref: (C_in, C_out); scale_ref/bias_ref: (1, C_out)
    # o_ref: (1, C_out, hw_tile) — lane-dense broadcast writeback.
    y = jnp.dot(s_ref[0], w_ref[...], preferred_element_type=jnp.float32)
    y = jnp.maximum(y * scale_ref[...] + bias_ref[...], 0.0)        # (1, C_out)
    o_ref[...] = jnp.broadcast_to(y.astype(o_ref.dtype)[:, :, None], o_ref.shape)


# ---------------------------------------------------------------------------
# Wrapper
# ---------------------------------------------------------------------------
def aspp_pooling(x, conv_w, bn_gamma, bn_beta, bn_mean, bn_var, eps=1e-5,
                 cin_tile_target=512, hw_tile_target=4096,
                 block_budget_bytes=8 << 20):
    """AsppPooling forward (eval-mode BN).

    x: (N, C_in, H, W) NCHW.  conv_w: (C_out, C_in, 1, 1)."""
    N, C_in, H, W = x.shape
    C_out = conv_w.shape[0]
    HW = H * W
    out_dtype = x.dtype
    x_bytes = jnp.dtype(x.dtype).itemsize
    out_bytes = jnp.dtype(out_dtype).itemsize

    # --- pass 1: streamed per-batch channel sums over the UNPADDED input -----
    c_tile, c_tiles = _channel_tiling(C_in, N, cin_tile_target)
    hw_tile, hw_tiles = _hw_tiling(HW, c_tile, x_bytes,
                                   block_budget_bytes, hw_tile_target)
    x_flat = x.reshape(N, C_in, HW)          # contiguous reshape, no copy

    in_block_bytes = c_tile * hw_tile * x_bytes
    sums = pl.pallas_call(
        _make_channel_sum_kernel(HW, hw_tile, hw_tiles),
        out_shape=jax.ShapeDtypeStruct((N, C_in, 1), jnp.float32),
        grid_spec=pltpu.PrefetchScalarGridSpec(
            num_scalar_prefetch=0,
            grid=(N, c_tiles, hw_tiles),
            in_specs=[pl.BlockSpec((1, c_tile, hw_tile),
                                   lambda n, c, k: (n, c, k))],
            out_specs=pl.BlockSpec((1, c_tile, 1),
                                   lambda n, c, k: (n, c, 0)),
        ),
        compiler_params=pltpu.CompilerParams(
            dimension_semantics=("parallel", "parallel", "arbitrary"),
            vmem_limit_bytes=_vmem_limit(in_block_bytes)),
        cost_estimate=pl.CostEstimate(
            flops=N * C_in * HW,
            transcendentals=0,
            bytes_accessed=N * C_in * HW * x_bytes + N * C_in * 4),
    )(x_flat)
    sums = sums.reshape(N, 1, C_in)          # channels -> lanes for the matmul

    # Fold BN (and 1/HW of the mean -- the TRUE HW) into scale/bias.
    scale = (bn_gamma.astype(jnp.float32)
             / jnp.sqrt(bn_var.astype(jnp.float32) + eps))
    bias = (bn_beta.astype(jnp.float32)
            - bn_mean.astype(jnp.float32) * scale).reshape(1, C_out)
    scale_eff = (scale / HW).reshape(1, C_out)
    w_t = conv_w.reshape(C_out, C_in).T.astype(jnp.float32)

    # --- pass 2+3 fused: 1x1-conv matmul + BN + ReLU on the pooled sums,
    #     broadcast over HW, written straight into (N, C_out, HW) -------------
    out_hw_tile, out_hw_tiles = _hw_tiling(HW, C_out, out_bytes,
                                           block_budget_bytes, hw_tile_target)
    out_block_bytes = C_out * out_hw_tile * out_bytes
    w_bytes = C_in * C_out * 4
    out_flat = pl.pallas_call(
        _conv_bn_relu_broadcast_kernel,
        out_shape=jax.ShapeDtypeStruct((N, C_out, HW), out_dtype),
        grid_spec=pltpu.PrefetchScalarGridSpec(
            num_scalar_prefetch=0,
            grid=(N, out_hw_tiles),
            in_specs=[pl.BlockSpec((1, 1, C_in), lambda n, k: (n, 0, 0)),
                      pl.BlockSpec((C_in, C_out), lambda n, k: (0, 0)),
                      pl.BlockSpec((1, C_out), lambda n, k: (0, 0)),
                      pl.BlockSpec((1, C_out), lambda n, k: (0, 0))],
            out_specs=pl.BlockSpec((1, C_out, out_hw_tile),
                                   lambda n, k: (n, 0, k)),
        ),
        compiler_params=pltpu.CompilerParams(
            dimension_semantics=("parallel", "parallel"),
            vmem_limit_bytes=_vmem_limit(out_block_bytes + w_bytes)),
        cost_estimate=pl.CostEstimate(
            flops=N * out_hw_tiles * 2 * C_in * C_out + N * C_out * HW,
            transcendentals=0,
            bytes_accessed=N * C_out * HW * out_bytes
                           + N * (C_in * 4 + w_bytes + 2 * C_out * 4)),
    )(sums, w_t, scale_eff, bias)

    return out_flat.reshape(N, C_out, H, W)


def aspp_pooling_ref(x, conv_w, bn_gamma, bn_beta, bn_mean, bn_var, eps=1e-5):
    """Pure-JAX reference for correctness."""
    N, C_in, H, W = x.shape
    C_out = conv_w.shape[0]
    mean = jnp.mean(x.astype(jnp.float32), axis=(2, 3))              # (N, C_in)
    y = mean @ conv_w.reshape(C_out, C_in).T.astype(jnp.float32)     # (N, C_out)
    scale = bn_gamma / jnp.sqrt(bn_var + eps)
    y = y * scale + (bn_beta - bn_mean * scale)
    y = jnp.maximum(y, 0.0)
    return jnp.broadcast_to(y[:, :, None, None], (N, C_out, H, W)).astype(x.dtype)


if __name__ == "__main__":
    key = jax.random.PRNGKey(0)

    def make_case(k, N, C_in, C_out, H, W):
        kx, kw, kg, kb, km, kv = jax.random.split(k, 6)
        x = jax.random.normal(kx, (N, C_in, H, W), dtype=jnp.float32)
        conv_w = jax.random.normal(kw, (C_out, C_in, 1, 1), dtype=jnp.float32) * 0.1
        bn_gamma = 1.0 + 0.1 * jax.random.normal(kg, (C_out,), dtype=jnp.float32)
        bn_beta = 0.05 * jax.random.normal(kb, (C_out,), dtype=jnp.float32)
        bn_mean = 0.01 * jax.random.normal(km, (C_out,), dtype=jnp.float32)
        bn_var = jnp.abs(1.0 + 0.1 * jax.random.normal(kv, (C_out,), dtype=jnp.float32))
        return x, conv_w, bn_gamma, bn_beta, bn_mean, bn_var

    k1, k2 = jax.random.split(key)

    # Case 1: nominal small shape (single full-HW block path, C_in not mult-of-8).
    args1 = make_case(k1, 2, 4, 8, 16, 16)
    out1 = jax.block_until_ready(aspp_pooling(*args1))
    ref1 = aspp_pooling_ref(*args1)
    assert out1.shape == ref1.shape
    assert jnp.allclose(out1, ref1, atol=1e-5, rtol=1e-5)

    # Case 2: non-128-aligned HW (17x17) + multiple channel tiles, with a tiny
    # block budget so the ragged-tile masking and the partial output-writeback
    # paths are actually exercised.
    args2 = make_case(k2, 1, 16, 8, 17, 17)
    out2 = jax.block_until_ready(
        aspp_pooling(*args2, cin_tile_target=8, block_budget_bytes=4096))
    ref2 = aspp_pooling_ref(*args2)
    assert out2.shape == ref2.shape
    assert jnp.allclose(out2, ref2, atol=1e-5, rtol=1e-5)

    print("KERNEL_OK")
</pallas_src>

<mosaic_0001>
module attributes {stable_mosaic.version = 11 : i64} {
  func.func @kernel(%arg0: i32, %arg1: i32, %arg2: i32, %arg3: memref<1x4x256xf32, #tpu.memory_space<vmem>>, %arg4: memref<1x4x1xf32, #tpu.memory_space<vmem>>) attributes {dimension_semantics = [#tpu.dimension_semantics<parallel>, #tpu.dimension_semantics<parallel>, #tpu.dimension_semantics<arbitrary>], iteration_bounds = array<i64: 2, 1, 1>, scalar_prefetch = 0 : i64, scratch_operands = 0 : i64, tpu.core_type = #tpu.core_type<tc>, window_params = [{transform_indices = @transform_0, window_bounds = array<i64: 1, 4, 256>}, {transform_indices = @transform_1, window_bounds = array<i64: 1, 4, 1>}]} {
    %c0 = arith.constant 0 : index
    %c0_0 = arith.constant 0 : index
    %c0_1 = arith.constant 0 : index
    %0 = vector.load %arg3[%c0, %c0_0, %c0_1] : memref<1x4x256xf32, #tpu.memory_space<vmem>>, vector<1x4x256xf32>
    %cst = arith.constant dense<0.000000e+00> : vector<1x4xf32>
    %1 = vector.multi_reduction <add>, %0, %cst [2] : vector<1x4x256xf32> to vector<1x4xf32>
    %2 = vector.shape_cast %1 : vector<1x4xf32> to vector<1x4x1xf32>
    %c0_i32 = arith.constant 0 : i32
    %3 = arith.cmpi eq, %arg2, %c0_i32 : i32
    %4 = arith.extui %3 : i1 to i32
    %c0_i32_2 = arith.constant 0 : i32
    %5 = arith.cmpi ne, %4, %c0_i32_2 : i32
    scf.if %5 {
      %c0_5 = arith.constant 0 : index
      %c0_6 = arith.constant 0 : index
      %c0_7 = arith.constant 0 : index
      %9 = vector.load %arg4[%c0_5, %c0_6, %c0_7] : memref<1x4x1xf32, #tpu.memory_space<vmem>>, vector<1x4x1xf32>
      tpu.vector_store %arg4[%c0_5, %c0_6, %c0_7], %2 {strides = array<i32>} : memref<1x4x1xf32, #tpu.memory_space<vmem>>, vector<1x4x1xf32>,
    } else {
    }
    %c0_i32_3 = arith.constant 0 : i32
    %6 = arith.cmpi ne, %arg2, %c0_i32_3 : i32
    %7 = arith.extui %6 : i1 to i32
    %c0_i32_4 = arith.constant 0 : i32
    %8 = arith.cmpi ne, %7, %c0_i32_4 : i32
    scf.if %8 {
      %c0_5 = arith.constant 0 : index
      %c0_6 = arith.constant 0 : index
      %c0_7 = arith.constant 0 : index
      %9 = vector.load %arg4[%c0_5, %c0_6, %c0_7] : memref<1x4x1xf32, #tpu.memory_space<vmem>>, vector<1x4x1xf32>
      %10 = arith.addf %9, %2 : vector<1x4x1xf32>
      %c0_8 = arith.constant 0 : index
      %c0_9 = arith.constant 0 : index
      %c0_10 = arith.constant 0 : index
      %11 = vector.load %arg4[%c0_8, %c0_9, %c0_10] : memref<1x4x1xf32, #tpu.memory_space<vmem>>, vector<1x4x1xf32>
      tpu.vector_store %arg4[%c0_8, %c0_9, %c0_10], %10 {strides = array<i32>} : memref<1x4x1xf32, #tpu.memory_space<vmem>>, vector<1x4x1xf32>,
    } else {
    }
    return
  }
  func.func @transform_0(%arg0: i32, %arg1: i32, %arg2: i32) -> (i32, i32, i32) {
    %c0_i32 = arith.constant 0 : i32
    return %arg0, %arg1, %arg2 : i32, i32, i32
  }
  func.func @transform_1(%arg0: i32, %arg1: i32, %arg2: i32) -> (i32, i32, i32) {
    %c0_i32 = arith.constant 0 : i32
    %c0_i32_0 = arith.constant 0 : i32
    return %arg0, %arg1, %c0_i32 : i32, i32, i32
  }
}

</mosaic_0001>

<bundles_post_ra>
// kernel: tpu_custom_call.1
= control target key start
LH: loop header
LB: loop body
LE: loop exit
PB: predicated region body
PF: predicated region fallthrough
CT: control target
= control target key end

     0   :  { %6 = vsyncpa [#allocation3], 0  ;;  %s537_s0 = inlined_call_operand.hbm [shape: f32[2,4,256], index: 0, kind: input, shape index: {}]   ;;  %s538_s1 = inlined_call_operand.vmem [shape: f32[2,4,1], index: 1, kind: output, shape index: {}]  }
   0x1   :  { %8 = vsyncpa [#allocation3 + $0x1], 0  ;;  %s449_s6 = smov 0   ;;  %s451_s7 = smov 0  }
   0x2   :  { %s453_s8 = smov 0   ;;  %s455_s9 = smov 0  }
   0x3   :  { %s457_s10 = smov 0   ;;  %s459_s11 = smov 0  }
   0x4 LB: > { %s289_s12 = sadd.s32 4294967295, %s437_s11   ;;  %s33_s13 = sadd.s32 1, %s433_s10  ;;  %s437_s11 = sphi %s459_s11, %s14_s11   ;;  %s433_s10 = sphi %s457_s10, %s545_s10   ;;  %s429_s9 = sphi %s455_s9, %s544_s9   ;;  %s425_s8 = sphi %s453_s8, %s543_s8   ;;  %s421_s7 = sphi %s451_s7, %s542_s7   ;;  %s417_s6 = sphi %s449_s6, %s541_s6  }
   0x5   : > { %p35_p0 = scmp.ge.s32.totalorder %s33_s13, 2  ;;  %s44_s14 = sadd.s32 1, %s425_s8 }
   0x6   : > { %p51_p1 = scmp.ne.s32.totalorder %s425_s8, %s421_s7  ;;  %p52_p2 = scmp.eq.s32.totalorder %s437_s11, 0 }
   0x7   : > { %s547_s13 = smov (%p35_p0, %s33_s13), 0  ;;  %p57_p4 = scmp.ne.s32.totalorder %s421_s7, %s417_s6 }
   0x8   : > { %p485_p3 = por %p52_p2, %p51_p1  ;;  %s37_s16 = ssub.s32 %s433_s10, %s547_s13 }
   0x9   : > { %p58_p5 = scmp.eq.s32.totalorder %s289_s12, 0  ;;  %p42_p6 = scmp.eq.s32.totalorder %s37_s16, 0 }
   0xa   : > { %p308_p8 = scmp.lt.s32.totalorder %s437_s11, 2  ;;  %s109_s19 = sand.u32 1, %s425_s8  }
   0xb   : > { %p492_p7 = por %p58_p5, %p57_p4  ;;  %s301_s20 = sshll.u32 %s433_s10, 3 }
   0xc   : > { %s498_s18 = scalar_select %p42_p6, %s425_s8, %s44_s14  }
   0xd   : > { %s293_s21 = sshll.u32 %s109_s19, 3  ;;  %s122_s24 = scalar_lea.hbm %s537_s0, %s301_s20 }
   0xe   : > { %s124_s25 = sshll.u32 %s122_s24, 4  ;;  %s113_s26 = scalar_lea.vmem [#allocation2], %s293_s21  ;;  %s125_s25 = int_to_ptr.hbm [resolvable:$true] %s124_s25 }
   0xf   : > { %s126_s27 = sshll.u32 %s113_s26, 4  ;;  %p305_p9 = pnand %p308_p8, %p485_p3  ;;  %s127_s27 = int_to_ptr.vmem [resolvable:$true] %s126_s27 }
  0x10   : > { %p296_p10 = scmp.ge.s32.totalorder %s437_s11, 1  ;;  %p131_p11 = scmp.lt.s32.totalorder %s437_s11, 3 }
  0x11   : > { %s110_s28 = scalar_lea.sflag [#allocation3], %s109_s19 }
  0x12   : > { %307 = dma.hbm_to_vmem [thread:$0]  (!%p305_p9), %s125_s25, 128, %s127_s27, %s110_s28  }
  0x13   : > { %p132_p12 = pnand %p296_p10, %p131_p11 }
  0x14   : > { %s137_s29 = sand.u32 (!%p132_p12), 1, %s421_s7  }
  0x15   : > { %135 = sbr.rel (%p132_p12) target bundleno = 156 (0x9c), region = 24  ;;  %s297_s30 = sshll.u32 (!%p132_p12), %s137_s29, 3 }
  0x16   : > { %s138_s2 = scalar_lea.sflag (!%p132_p12), [#allocation3], %s137_s29  ;;  %s141_s3 = scalar_lea.vmem (!%p132_p12), [#allocation2], %s297_s30 }
  0x1a   : > { %412 = dma.done.wait (%p492_p7), %s138_s2, 128  }
  0x1b   : > { %414 = vsyncadd (%p492_p7), %s138_s2, 4294967168  ;;  %v171_v0 = vld [vmem:[%s141_s3] sm:$0xff]  ;;  %vm178_vm0 = vcmask 1043456   ;;  %p164_p13 = scmp.lt.s32.totalorder %s429_s9, 1  ;;  %vm188_vm1 = vcmask 3072  }
  0x1c   : > { %173 = vst [vmem:[#allocation1] ss:$2 sm:$0xff] %v171_v0 }
  0x1d   : > { %s549_s9 = smov (!%p164_p13, %s429_s9), 1 }
  0x1e   : > { %s298_s4 = sshll.u32 %s549_s9, 2 }
  0x1f   : > { %s170_s12 = scalar_lea.vmem %s538_s1, %s298_s4 }
  0x23   : > { %v174_v1 = vld.sshfl [vmem:[#allocation1] sm:$0xff pattern:$0x75316420]  ;;  %v175_v2 = vld.sshfl [vmem:[#allocation1 + $0x8] sm:$0xff pattern:$0x75316420] }
  0x24   : > { %v179_v3 = vsel %vm178_vm0, %v174_v1, 0.0  ;;  %v180_v4 = vsel %vm178_vm0, %v175_v2, 0.0 }
  0x25   : > { %v181_v5 = vadd.f32 %v180_v4, %v179_v3 }
  0x27   : > { %182 = vadd.xlane.f32.xlu0 %v181_v5 }
  0x9a   : > { %v183_v6 = vpop.xlane.xlu0 %182 }
  0x9b   : > { %189 = vst.msk [vmem:[%s170_s12] sm:$0xf] %vm188_vm1, %v183_v6 }
  0x9c PF: > { %s14_s11 = sadd.s32 1, %s437_s11   ;;  %s541_s6 = smov %s421_s7 }
  0x9d   : > { %p11_p0 = scmp.ge.s32.totalorder %s14_s11, 4   ;;  %s542_s7 = smov %s425_s8 }
  0x9e   : > { %s543_s8 = smov %s498_s18  ;;  %s544_s9 = smov %s433_s10 }
  0x9f   : > { %s545_s10 = smov %s547_s13  ;;  %13 = sbr.rel (!%p11_p0) target bundleno = 4 (0x4), region = 72 }
  0xa4   :  { %223 = vsyncpa [#allocation3], 1 }
  0xa5   :  { %225 = vsyncpa [#allocation3 + $0x1], 1 }

</bundles_post_ra>
